<compile_context>
chip_gen: v7x
topology: tpu7x:2x2x1
jax: 0.10.0
libtpu: 0.0.40
codegen_flags: <defaults>
</compile_context>

<pallas_src>
import functools

import jax
import jax.numpy as jnp
from jax.experimental import pallas as pl
from jax.experimental.pallas import tpu as pltpu


_LANE = 128
_MAX_TILE_P = 4096       # measured mem-bound kernels saturate HBM by ~512-1024
_MIN_GRID_STEPS = 8      # >= 4 steps per TensorCore on v7x


def _cdiv(a, b):
    return -(-a // b)


def _round_up(x, m):
    return _cdiv(x, m) * m


def _vmem_limit_bytes():
    cap = None
    try:
        cap = getattr(pltpu.get_tpu_info(), "vmem_capacity_bytes", None)
    except Exception:
        cap = None
    if not cap:
        cap = 64 << 20  # conservative: v7x per-TensorCore VMEM
    # ~40 MiB on v7x (64 MiB phys), capped at 48 MiB on 128 MiB parts.
    return int(min(cap * 5 // 8, 48 << 20))


def _bf16_compute_ok():
    # bf16 VALU exists on v6e / v7x; keep f32 elsewhere (v2-v5e).
    try:
        kind = jax.devices()[0].device_kind.lower()
    except Exception:
        return False
    return any(tag in kind for tag in ("v6", "v7", "7x"))


def _depth_ffn_kernel(w_ref, b_ref, x_ref, l_ref, o_ref, *, compute_dtype):
    C_out = w_ref.shape[0]
    D = l_ref.shape[1] - 1

    # --- channel_reduce: 1x1 conv as matmul (BN scale folded into weight) ---
    feat = jnp.dot(w_ref[...], x_ref[0],
                   preferred_element_type=jnp.float32)          # (C_out, tP)
    feat = jnp.maximum(feat + b_ref[...], 0.0)                  # BN bias + ReLU

    # --- depth distribution: softmax over D+1 bins (f32), drop last bin ---
    logits = l_ref[0].astype(jnp.float32)                       # (D+1, tP)
    m = jnp.max(logits, axis=0, keepdims=True)
    e = jnp.exp(logits - m)
    inv = pl.reciprocal(jnp.sum(e, axis=0, keepdims=True), approx=True)
    probs = (e[:-1, :] * inv).astype(compute_dtype)             # (D, tP)
    feat = feat.astype(compute_dtype)

    # --- frustum features, written sublane-dense into the merged C_out*D axis ---
    for c in range(C_out):
        o_ref[0, c * D:(c + 1) * D, :] = (
            feat[c:c + 1, :] * probs).astype(o_ref.dtype)


def _pick_tile_p(P, N, per_lane_bytes, block_budget):
    tile_p = (block_budget // max(per_lane_bytes, 1)) // _LANE * _LANE
    tile_p = int(max(_LANE, min(tile_p, _MAX_TILE_P, _round_up(P, _LANE))))
    # Keep enough grid steps for double-buffering and 2-TensorCore occupancy.
    while tile_p > _LANE and N * _cdiv(P, tile_p) < _MIN_GRID_STEPS:
        tile_p = max(_LANE, (tile_p // 2) // _LANE * _LANE)
    return tile_p


def depth_ffn_forward(image_features, depth_logits, conv_w,
                      bn_gamma, bn_beta, bn_mean, bn_var,
                      eps=1e-5, out_dtype=jnp.bfloat16, tile_p=None,
                      compute_dtype=None):
    """
    image_features: (N, C_in, H, W)        (DDN 'features')
    depth_logits:   (N, D+1, H, W)         (DDN 'logits')
    conv_w:         (C_out, C_in, 1, 1)    1x1 conv weight (bias=False)
    bn_*:           (C_out,)               BatchNorm2d params (eval mode)
    returns frustum_features: (N, C_out, D, H, W) in `out_dtype`
    """
    N, C_in, H, W = image_features.shape
    _, Dp1, _, _ = depth_logits.shape
    C_out = conv_w.shape[0]
    D = Dp1 - 1
    P = H * W

    if compute_dtype is None:
        compute_dtype = (jnp.bfloat16
                         if jnp.dtype(out_dtype) == jnp.bfloat16 and _bf16_compute_ok()
                         else jnp.float32)

    vmem_limit = _vmem_limit_bytes()
    block_budget = vmem_limit // 2

    in_bytes = jnp.dtype(image_features.dtype).itemsize
    log_bytes = jnp.dtype(depth_logits.dtype).itemsize
    out_bytes = jnp.dtype(out_dtype).itemsize
    cmp_bytes = jnp.dtype(compute_dtype).itemsize

    if tile_p is None:
        # Double-buffered I/O blocks plus in-kernel compute intermediates, per lane.
        per_lane = (2 * (C_in * in_bytes + Dp1 * log_bytes)       # input blocks
                    + 2 * (C_out * D * out_bytes)                 # output block
                    + (2 * Dp1 + D + C_out) * 4                   # logits, e, probs, feat (f32)
                    + (2 * D + C_out) * cmp_bytes)                # casts + product slab
        tile_p = _pick_tile_p(P, N, per_lane, block_budget)
    assert tile_p % _LANE == 0

    num_pt = _cdiv(P, tile_p)

    # Flatten spatial dims to the lane axis; no padding (ragged last tile is
    # handled by Pallas boundary-block clipping).
    x = image_features.reshape(N, C_in, P)
    l = depth_logits.reshape(N, Dp1, P)

    # Fold BN (eval mode) into the 1x1 conv: y = relu(W_fold @ x + bias)
    scale = bn_gamma / jnp.sqrt(bn_var + eps)
    w_folded = (conv_w[:, :, 0, 0] * scale[:, None]).astype(image_features.dtype)
    bias = (bn_beta - bn_mean * scale).reshape(C_out, 1).astype(jnp.float32)

    kernel = functools.partial(_depth_ffn_kernel, compute_dtype=compute_dtype)

    out = pl.pallas_call(
        kernel,
        out_shape=jax.ShapeDtypeStruct((N, C_out * D, P), out_dtype),
        grid_spec=pltpu.PrefetchScalarGridSpec(
            num_scalar_prefetch=0,
            grid=(N, num_pt),
            in_specs=[
                pl.BlockSpec((C_out, C_in), lambda n, p: (0, 0)),
                pl.BlockSpec((C_out, 1), lambda n, p: (0, 0)),
                pl.BlockSpec((1, C_in, tile_p), lambda n, p: (n, 0, p)),
                pl.BlockSpec((1, Dp1, tile_p), lambda n, p: (n, 0, p)),
            ],
            out_specs=pl.BlockSpec((1, C_out * D, tile_p),
                                   lambda n, p: (n, 0, p)),
        ),
        compiler_params=pltpu.CompilerParams(
            dimension_semantics=("parallel", "parallel"),
            vmem_limit_bytes=vmem_limit),
    )(w_folded, bias, x, l)

    return out.reshape(N, C_out, D, H, W)


def depth_ffn_reference(image_features, depth_logits, conv_w,
                        bn_gamma, bn_beta, bn_mean, bn_var, eps=1e-5):
    # Pure-JAX reference mirroring the PyTorch forward (eval mode BN).
    feat = jnp.einsum('oc,nchw->nohw', conv_w[:, :, 0, 0], image_features)
    scale = bn_gamma / jnp.sqrt(bn_var + eps)
    feat = feat * scale[None, :, None, None] + \
        (bn_beta - bn_mean * scale)[None, :, None, None]
    feat = jnp.maximum(feat, 0.0)                          # (N, C, H, W)
    probs = jax.nn.softmax(depth_logits, axis=1)[:, :-1]   # (N, D, H, W)
    return probs[:, None, :, :, :] * feat[:, :, None, :, :]


def _run_case(seed, N, C_in, C_out, num_bins, H, W):
    key = jax.random.PRNGKey(seed)
    k1, k2, k3, k4, k5, k6, k7 = jax.random.split(key, 7)

    image_features = jax.random.normal(k1, (N, C_in, H, W), jnp.float32)
    depth_logits = jax.random.normal(k2, (N, num_bins + 1, H, W), jnp.float32)

    # Deterministic params (BasicBlock2D: Conv2d(k=1, bias=False) + BN + ReLU)
    conv_w = 0.1 * jax.random.normal(k3, (C_out, C_in, 1, 1), jnp.float32)
    bn_gamma = 1.0 + 0.05 * jax.random.normal(k4, (C_out,), jnp.float32)
    bn_beta = 0.05 * jax.random.normal(k5, (C_out,), jnp.float32)
    bn_mean = 0.05 * jax.random.normal(k6, (C_out,), jnp.float32)
    bn_var = jnp.abs(jax.random.normal(k7, (C_out,), jnp.float32)) + 0.5

    ref = depth_ffn_reference(image_features, depth_logits, conv_w,
                              bn_gamma, bn_beta, bn_mean, bn_var)

    # f32 output path (approx reciprocal in the softmax -> slightly loosened tol)
    out_f32 = depth_ffn_forward(image_features, depth_logits, conv_w,
                                bn_gamma, bn_beta, bn_mean, bn_var,
                                out_dtype=jnp.float32)
    out_f32 = jax.block_until_ready(out_f32)
    assert out_f32.shape == (N, C_out, num_bins, H, W)
    assert jnp.allclose(out_f32, ref, atol=1e-3, rtol=1e-2)

    # default bf16 output path (halves the dominant HBM writeback)
    out_bf16 = depth_ffn_forward(image_features, depth_logits, conv_w,
                                 bn_gamma, bn_beta, bn_mean, bn_var)
    out_bf16 = jax.block_until_ready(out_bf16)
    assert out_bf16.dtype == jnp.bfloat16
    assert out_bf16.shape == (N, C_out, num_bins, H, W)
    assert jnp.allclose(out_bf16.astype(jnp.float32), ref, atol=4e-2, rtol=4e-2)


if __name__ == "__main__":
    # Case 1: exact lane multiple (H*W = 256)
    _run_case(0, N=2, C_in=32, C_out=16, num_bins=10, H=8, W=32)
    # Case 2: non-multiple spatial extent (H*W = 481 -> ragged last tile,
    # handled in-grid by Pallas boundary-block clipping; no wrapper pad/slice)
    _run_case(1, N=2, C_in=32, C_out=16, num_bins=8, H=13, W=37)
    print("KERNEL_OK")
</pallas_src>

<mosaic_0001>
module attributes {stable_mosaic.version = 11 : i64} {
  func.func @_depth_ffn_kernel(%arg0: i32, %arg1: i32, %arg2: memref<16x32xf32, #tpu.memory_space<vmem>>, %arg3: memref<16x1xf32, #tpu.memory_space<vmem>>, %arg4: memref<1x32x128xf32, #tpu.memory_space<vmem>>, %arg5: memref<1x11x128xf32, #tpu.memory_space<vmem>>, %arg6: memref<1x160x128xf32, #tpu.memory_space<vmem>>) attributes {dimension_semantics = [#tpu.dimension_semantics<parallel>, #tpu.dimension_semantics<parallel>], iteration_bounds = array<i64: 2, 2>, scalar_prefetch = 0 : i64, scratch_operands = 0 : i64, tpu.core_type = #tpu.core_type<tc>, window_params = [{pipeline_mode = #tpu.pipeline_mode<synchronous>, transform_indices = @transform_0, window_bounds = array<i64: 16, 32>}, {pipeline_mode = #tpu.pipeline_mode<synchronous>, transform_indices = @transform_1, window_bounds = array<i64: 16, 1>}, {transform_indices = @transform_2, window_bounds = array<i64: 1, 32, 128>}, {transform_indices = @transform_3, window_bounds = array<i64: 1, 11, 128>}, {transform_indices = @transform_4, window_bounds = array<i64: 1, 160, 128>}]} {
    %c0 = arith.constant 0 : index
    %c0_0 = arith.constant 0 : index
    %0 = vector.load %arg2[%c0, %c0_0] : memref<16x32xf32, #tpu.memory_space<vmem>>, vector<16x32xf32>
    %c0_1 = arith.constant 0 : index
    %c0_2 = arith.constant 0 : index
    %c0_3 = arith.constant 0 : index
    %1 = vector.load %arg4[%c0_1, %c0_2, %c0_3] : memref<1x32x128xf32, #tpu.memory_space<vmem>>, vector<1x32x128xf32>
    %2 = vector.shape_cast %1 : vector<1x32x128xf32> to vector<32x128xf32>
    %cst = arith.constant dense<0.000000e+00> : vector<16x128xf32>
    %3 = tpu.matmul %0, %2, %cst {dimension_numbers = #tpu.dot_dimension_numbers<[1], [0], [0], [1], [0, 0, 1, 1], [], []>} : vector<16x32xf32>, vector<32x128xf32>, vector<16x128xf32> -> vector<16x128xf32>
    %c0_4 = arith.constant 0 : index
    %c0_5 = arith.constant 0 : index
    %4 = vector.load %arg3[%c0_4, %c0_5] : memref<16x1xf32, #tpu.memory_space<vmem>>, vector<16x1xf32>
    %5 = vector.broadcast %4 : vector<16x1xf32> to vector<16x128xf32>
    %6 = arith.addf %3, %5 : vector<16x128xf32>
    %cst_6 = arith.constant 0.000000e+00 : f32
    %7 = vector.broadcast %cst_6 : f32 to vector<16x128xf32>
    %8 = arith.maximumf %6, %7 : vector<16x128xf32>
    %c0_7 = arith.constant 0 : index
    %c0_8 = arith.constant 0 : index
    %c0_9 = arith.constant 0 : index
    %9 = vector.load %arg5[%c0_7, %c0_8, %c0_9] : memref<1x11x128xf32, #tpu.memory_space<vmem>>, vector<1x11x128xf32>
    %10 = vector.shape_cast %9 : vector<1x11x128xf32> to vector<11x128xf32>
    %cst_10 = arith.constant dense<0xFF800000> : vector<128xf32>
    %11 = vector.multi_reduction <maximumf>, %10, %cst_10 [0] : vector<11x128xf32> to vector<128xf32>
    %12 = vector.shape_cast %11 : vector<128xf32> to vector<1x128xf32>
    %13 = vector.broadcast %12 : vector<1x128xf32> to vector<11x128xf32>
    %14 = arith.subf %10, %13 : vector<11x128xf32>
    %15 = math.exp %14 : vector<11x128xf32>
    %cst_11 = arith.constant dense<0.000000e+00> : vector<128xf32>
    %16 = vector.multi_reduction <add>, %15, %cst_11 [0] : vector<11x128xf32> to vector<128xf32>
    %17 = vector.shape_cast %16 : vector<128xf32> to vector<1x128xf32>
    %18 = tpu.reciprocal %17 {approx = true} : vector<1x128xf32> -> vector<1x128xf32>
    %19 = vector.extract_strided_slice %15 {offsets = [0, 0], sizes = [10, 128], strides = [1, 1]} : vector<11x128xf32> to vector<10x128xf32>
    %20 = vector.broadcast %18 : vector<1x128xf32> to vector<10x128xf32>
    %21 = arith.mulf %19, %20 : vector<10x128xf32>
    %22 = vector.extract_strided_slice %8 {offsets = [0, 0], sizes = [1, 128], strides = [1, 1]} : vector<16x128xf32> to vector<1x128xf32>
    %23 = vector.broadcast %22 : vector<1x128xf32> to vector<10x128xf32>
    %24 = arith.mulf %23, %21 : vector<10x128xf32>
    %c0_12 = arith.constant 0 : index
    %c0_13 = arith.constant 0 : index
    %c0_14 = arith.constant 0 : index
    %25 = vector.load %arg6[%c0_12, %c0_13, %c0_14] : memref<1x160x128xf32, #tpu.memory_space<vmem>>, vector<1x10x128xf32>
    %26 = vector.shape_cast %25 : vector<1x10x128xf32> to vector<10x128xf32>
    %27 = vector.shape_cast %24 : vector<10x128xf32> to vector<1x10x128xf32>
    tpu.vector_store %arg6[%c0_12, %c0_13, %c0_14], %27 {strides = array<i32>} : memref<1x160x128xf32, #tpu.memory_space<vmem>>, vector<1x10x128xf32>,
    %28 = vector.extract_strided_slice %8 {offsets = [1, 0], sizes = [1, 128], strides = [1, 1]} : vector<16x128xf32> to vector<1x128xf32>
    %29 = vector.broadcast %28 : vector<1x128xf32> to vector<10x128xf32>
    %30 = arith.mulf %29, %21 : vector<10x128xf32>
    %c0_15 = arith.constant 0 : index
    %c10 = arith.constant 10 : index
    %c0_16 = arith.constant 0 : index
    %31 = vector.load %arg6[%c0_15, %c10, %c0_16] : memref<1x160x128xf32, #tpu.memory_space<vmem>>, vector<1x10x128xf32>
    %32 = vector.shape_cast %31 : vector<1x10x128xf32> to vector<10x128xf32>
    %33 = vector.shape_cast %30 : vector<10x128xf32> to vector<1x10x128xf32>
    tpu.vector_store %arg6[%c0_15, %c10, %c0_16], %33 {strides = array<i32>} : memref<1x160x128xf32, #tpu.memory_space<vmem>>, vector<1x10x128xf32>,
    %34 = vector.extract_strided_slice %8 {offsets = [2, 0], sizes = [1, 128], strides = [1, 1]} : vector<16x128xf32> to vector<1x128xf32>
    %35 = vector.broadcast %34 : vector<1x128xf32> to vector<10x128xf32>
    %36 = arith.mulf %35, %21 : vector<10x128xf32>
    %c0_17 = arith.constant 0 : index
    %c20 = arith.constant 20 : index
    %c0_18 = arith.constant 0 : index
    %37 = vector.load %arg6[%c0_17, %c20, %c0_18] : memref<1x160x128xf32, #tpu.memory_space<vmem>>, vector<1x10x128xf32>
    %38 = vector.shape_cast %37 : vector<1x10x128xf32> to vector<10x128xf32>
    %39 = vector.shape_cast %36 : vector<10x128xf32> to vector<1x10x128xf32>
    tpu.vector_store %arg6[%c0_17, %c20, %c0_18], %39 {strides = array<i32>} : memref<1x160x128xf32, #tpu.memory_space<vmem>>, vector<1x10x128xf32>,
    %40 = vector.extract_strided_slice %8 {offsets = [3, 0], sizes = [1, 128], strides = [1, 1]} : vector<16x128xf32> to vector<1x128xf32>
    %41 = vector.broadcast %40 : vector<1x128xf32> to vector<10x128xf32>
    %42 = arith.mulf %41, %21 : vector<10x128xf32>
    %c0_19 = arith.constant 0 : index
    %c30 = arith.constant 30 : index
    %c0_20 = arith.constant 0 : index
    %43 = vector.load %arg6[%c0_19, %c30, %c0_20] : memref<1x160x128xf32, #tpu.memory_space<vmem>>, vector<1x10x128xf32>
    %44 = vector.shape_cast %43 : vector<1x10x128xf32> to vector<10x128xf32>
    %45 = vector.shape_cast %42 : vector<10x128xf32> to vector<1x10x128xf32>
    tpu.vector_store %arg6[%c0_19, %c30, %c0_20], %45 {strides = array<i32>} : memref<1x160x128xf32, #tpu.memory_space<vmem>>, vector<1x10x128xf32>,
    %46 = vector.extract_strided_slice %8 {offsets = [4, 0], sizes = [1, 128], strides = [1, 1]} : vector<16x128xf32> to vector<1x128xf32>
    %47 = vector.broadcast %46 : vector<1x128xf32> to vector<10x128xf32>
    %48 = arith.mulf %47, %21 : vector<10x128xf32>
    %c0_21 = arith.constant 0 : index
    %c40 = arith.constant 40 : index
    %c0_22 = arith.constant 0 : index
    %49 = vector.load %arg6[%c0_21, %c40, %c0_22] : memref<1x160x128xf32, #tpu.memory_space<vmem>>, vector<1x10x128xf32>
    %50 = vector.shape_cast %49 : vector<1x10x128xf32> to vector<10x128xf32>
    %51 = vector.shape_cast %48 : vector<10x128xf32> to vector<1x10x128xf32>
    tpu.vector_store %arg6[%c0_21, %c40, %c0_22], %51 {strides = array<i32>} : memref<1x160x128xf32, #tpu.memory_space<vmem>>, vector<1x10x128xf32>,
    %52 = vector.extract_strided_slice %8 {offsets = [5, 0], sizes = [1, 128], strides = [1, 1]} : vector<16x128xf32> to vector<1x128xf32>
    %53 = vector.broadcast %52 : vector<1x128xf32> to vector<10x128xf32>
    %54 = arith.mulf %53, %21 : vector<10x128xf32>
    %c0_23 = arith.constant 0 : index
    %c50 = arith.constant 50 : index
    %c0_24 = arith.constant 0 : index
    %55 = vector.load %arg6[%c0_23, %c50, %c0_24] : memref<1x160x128xf32, #tpu.memory_space<vmem>>, vector<1x10x128xf32>
    %56 = vector.shape_cast %55 : vector<1x10x128xf32> to vector<10x128xf32>
    %57 = vector.shape_cast %54 : vector<10x128xf32> to vector<1x10x128xf32>
    tpu.vector_store %arg6[%c0_23, %c50, %c0_24], %57 {strides = array<i32>} : memref<1x160x128xf32, #tpu.memory_space<vmem>>, vector<1x10x128xf32>,
    %58 = vector.extract_strided_slice %8 {offsets = [6, 0], sizes = [1, 128], strides = [1, 1]} : vector<16x128xf32> to vector<1x128xf32>
    %59 = vector.broadcast %58 : vector<1x128xf32> to vector<10x128xf32>
    %60 = arith.mulf %59, %21 : vector<10x128xf32>
    %c0_25 = arith.constant 0 : index
    %c60 = arith.constant 60 : index
    %c0_26 = arith.constant 0 : index
    %61 = vector.load %arg6[%c0_25, %c60, %c0_26] : memref<1x160x128xf32, #tpu.memory_space<vmem>>, vector<1x10x128xf32>
    %62 = vector.shape_cast %61 : vector<1x10x128xf32> to vector<10x128xf32>
    %63 = vector.shape_cast %60 : vector<10x128xf32> to vector<1x10x128xf32>
    tpu.vector_store %arg6[%c0_25, %c60, %c0_26], %63 {strides = array<i32>} : memref<1x160x128xf32, #tpu.memory_space<vmem>>, vector<1x10x128xf32>,
    %64 = vector.extract_strided_slice %8 {offsets = [7, 0], sizes = [1, 128], strides = [1, 1]} : vector<16x128xf32> to vector<1x128xf32>
    %65 = vector.broadcast %64 : vector<1x128xf32> to vector<10x128xf32>
    %66 = arith.mulf %65, %21 : vector<10x128xf32>
    %c0_27 = arith.constant 0 : index
    %c70 = arith.constant 70 : index
    %c0_28 = arith.constant 0 : index
    %67 = vector.load %arg6[%c0_27, %c70, %c0_28] : memref<1x160x128xf32, #tpu.memory_space<vmem>>, vector<1x10x128xf32>
    %68 = vector.shape_cast %67 : vector<1x10x128xf32> to vector<10x128xf32>
    %69 = vector.shape_cast %66 : vector<10x128xf32> to vector<1x10x128xf32>
    tpu.vector_store %arg6[%c0_27, %c70, %c0_28], %69 {strides = array<i32>} : memref<1x160x128xf32, #tpu.memory_space<vmem>>, vector<1x10x128xf32>,
    %70 = vector.extract_strided_slice %8 {offsets = [8, 0], sizes = [1, 128], strides = [1, 1]} : vector<16x128xf32> to vector<1x128xf32>
    %71 = vector.broadcast %70 : vector<1x128xf32> to vector<10x128xf32>
    %72 = arith.mulf %71, %21 : vector<10x128xf32>
    %c0_29 = arith.constant 0 : index
    %c80 = arith.constant 80 : index
    %c0_30 = arith.constant 0 : index
    %73 = vector.load %arg6[%c0_29, %c80, %c0_30] : memref<1x160x128xf32, #tpu.memory_space<vmem>>, vector<1x10x128xf32>
    %74 = vector.shape_cast %73 : vector<1x10x128xf32> to vector<10x128xf32>
    %75 = vector.shape_cast %72 : vector<10x128xf32> to vector<1x10x128xf32>
    tpu.vector_store %arg6[%c0_29, %c80, %c0_30], %75 {strides = array<i32>} : memref<1x160x128xf32, #tpu.memory_space<vmem>>, vector<1x10x128xf32>,
    %76 = vector.extract_strided_slice %8 {offsets = [9, 0], sizes = [1, 128], strides = [1, 1]} : vector<16x128xf32> to vector<1x128xf32>
    %77 = vector.broadcast %76 : vector<1x128xf32> to vector<10x128xf32>
    %78 = arith.mulf %77, %21 : vector<10x128xf32>
    %c0_31 = arith.constant 0 : index
    %c90 = arith.constant 90 : index
    %c0_32 = arith.constant 0 : index
    %79 = vector.load %arg6[%c0_31, %c90, %c0_32] : memref<1x160x128xf32, #tpu.memory_space<vmem>>, vector<1x10x128xf32>
    %80 = vector.shape_cast %79 : vector<1x10x128xf32> to vector<10x128xf32>
    %81 = vector.shape_cast %78 : vector<10x128xf32> to vector<1x10x128xf32>
    tpu.vector_store %arg6[%c0_31, %c90, %c0_32], %81 {strides = array<i32>} : memref<1x160x128xf32, #tpu.memory_space<vmem>>, vector<1x10x128xf32>,
    %82 = vector.extract_strided_slice %8 {offsets = [10, 0], sizes = [1, 128], strides = [1, 1]} : vector<16x128xf32> to vector<1x128xf32>
    %83 = vector.broadcast %82 : vector<1x128xf32> to vector<10x128xf32>
    %84 = arith.mulf %83, %21 : vector<10x128xf32>
    %c0_33 = arith.constant 0 : index
    %c100 = arith.constant 100 : index
    %c0_34 = arith.constant 0 : index
    %85 = vector.load %arg6[%c0_33, %c100, %c0_34] : memref<1x160x128xf32, #tpu.memory_space<vmem>>, vector<1x10x128xf32>
    %86 = vector.shape_cast %85 : vector<1x10x128xf32> to vector<10x128xf32>
    %87 = vector.shape_cast %84 : vector<10x128xf32> to vector<1x10x128xf32>
    tpu.vector_store %arg6[%c0_33, %c100, %c0_34], %87 {strides = array<i32>} : memref<1x160x128xf32, #tpu.memory_space<vmem>>, vector<1x10x128xf32>,
    %88 = vector.extract_strided_slice %8 {offsets = [11, 0], sizes = [1, 128], strides = [1, 1]} : vector<16x128xf32> to vector<1x128xf32>
    %89 = vector.broadcast %88 : vector<1x128xf32> to vector<10x128xf32>
    %90 = arith.mulf %89, %21 : vector<10x128xf32>
    %c0_35 = arith.constant 0 : index
    %c110 = arith.constant 110 : index
    %c0_36 = arith.constant 0 : index
    %91 = vector.load %arg6[%c0_35, %c110, %c0_36] : memref<1x160x128xf32, #tpu.memory_space<vmem>>, vector<1x10x128xf32>
    %92 = vector.shape_cast %91 : vector<1x10x128xf32> to vector<10x128xf32>
    %93 = vector.shape_cast %90 : vector<10x128xf32> to vector<1x10x128xf32>
    tpu.vector_store %arg6[%c0_35, %c110, %c0_36], %93 {strides = array<i32>} : memref<1x160x128xf32, #tpu.memory_space<vmem>>, vector<1x10x128xf32>,
    %94 = vector.extract_strided_slice %8 {offsets = [12, 0], sizes = [1, 128], strides = [1, 1]} : vector<16x128xf32> to vector<1x128xf32>
    %95 = vector.broadcast %94 : vector<1x128xf32> to vector<10x128xf32>
    %96 = arith.mulf %95, %21 : vector<10x128xf32>
    %c0_37 = arith.constant 0 : index
    %c120 = arith.constant 120 : index
    %c0_38 = arith.constant 0 : index
    %97 = vector.load %arg6[%c0_37, %c120, %c0_38] : memref<1x160x128xf32, #tpu.memory_space<vmem>>, vector<1x10x128xf32>
    %98 = vector.shape_cast %97 : vector<1x10x128xf32> to vector<10x128xf32>
    %99 = vector.shape_cast %96 : vector<10x128xf32> to vector<1x10x128xf32>
    tpu.vector_store %arg6[%c0_37, %c120, %c0_38], %99 {strides = array<i32>} : memref<1x160x128xf32, #tpu.memory_space<vmem>>, vector<1x10x128xf32>,
    %100 = vector.extract_strided_slice %8 {offsets = [13, 0], sizes = [1, 128], strides = [1, 1]} : vector<16x128xf32> to vector<1x128xf32>
    %101 = vector.broadcast %100 : vector<1x128xf32> to vector<10x128xf32>
    %102 = arith.mulf %101, %21 : vector<10x128xf32>
    %c0_39 = arith.constant 0 : index
    %c130 = arith.constant 130 : index
    %c0_40 = arith.constant 0 : index
    %103 = vector.load %arg6[%c0_39, %c130, %c0_40] : memref<1x160x128xf32, #tpu.memory_space<vmem>>, vector<1x10x128xf32>
    %104 = vector.shape_cast %103 : vector<1x10x128xf32> to vector<10x128xf32>
    %105 = vector.shape_cast %102 : vector<10x128xf32> to vector<1x10x128xf32>
    tpu.vector_store %arg6[%c0_39, %c130, %c0_40], %105 {strides = array<i32>} : memref<1x160x128xf32, #tpu.memory_space<vmem>>, vector<1x10x128xf32>,
    %106 = vector.extract_strided_slice %8 {offsets = [14, 0], sizes = [1, 128], strides = [1, 1]} : vector<16x128xf32> to vector<1x128xf32>
    %107 = vector.broadcast %106 : vector<1x128xf32> to vector<10x128xf32>
    %108 = arith.mulf %107, %21 : vector<10x128xf32>
    %c0_41 = arith.constant 0 : index
    %c140 = arith.constant 140 : index
    %c0_42 = arith.constant 0 : index
    %109 = vector.load %arg6[%c0_41, %c140, %c0_42] : memref<1x160x128xf32, #tpu.memory_space<vmem>>, vector<1x10x128xf32>
    %110 = vector.shape_cast %109 : vector<1x10x128xf32> to vector<10x128xf32>
    %111 = vector.shape_cast %108 : vector<10x128xf32> to vector<1x10x128xf32>
    tpu.vector_store %arg6[%c0_41, %c140, %c0_42], %111 {strides = array<i32>} : memref<1x160x128xf32, #tpu.memory_space<vmem>>, vector<1x10x128xf32>,
    %112 = vector.extract_strided_slice %8 {offsets = [15, 0], sizes = [1, 128], strides = [1, 1]} : vector<16x128xf32> to vector<1x128xf32>
    %113 = vector.broadcast %112 : vector<1x128xf32> to vector<10x128xf32>
    %114 = arith.mulf %113, %21 : vector<10x128xf32>
    %c0_43 = arith.constant 0 : index
    %c150 = arith.constant 150 : index
    %c0_44 = arith.constant 0 : index
    %115 = vector.load %arg6[%c0_43, %c150, %c0_44] : memref<1x160x128xf32, #tpu.memory_space<vmem>>, vector<1x10x128xf32>
    %116 = vector.shape_cast %115 : vector<1x10x128xf32> to vector<10x128xf32>
    %117 = vector.shape_cast %114 : vector<10x128xf32> to vector<1x10x128xf32>
    tpu.vector_store %arg6[%c0_43, %c150, %c0_44], %117 {strides = array<i32>} : memref<1x160x128xf32, #tpu.memory_space<vmem>>, vector<1x10x128xf32>,
    return
  }
  func.func @transform_0(%arg0: i32, %arg1: i32) -> (i32, i32) {
    %c0_i32 = arith.constant 0 : i32
    %c0_i32_0 = arith.constant 0 : i32
    %c0_i32_1 = arith.constant 0 : i32
    return %c0_i32, %c0_i32_0 : i32, i32
  }
  func.func @transform_1(%arg0: i32, %arg1: i32) -> (i32, i32) {
    %c0_i32 = arith.constant 0 : i32
    %c0_i32_0 = arith.constant 0 : i32
    %c0_i32_1 = arith.constant 0 : i32
    return %c0_i32, %c0_i32_0 : i32, i32
  }
  func.func @transform_2(%arg0: i32, %arg1: i32) -> (i32, i32, i32) {
    %c0_i32 = arith.constant 0 : i32
    %c0_i32_0 = arith.constant 0 : i32
    return %arg0, %c0_i32, %arg1 : i32, i32, i32
  }
  func.func @transform_3(%arg0: i32, %arg1: i32) -> (i32, i32, i32) {
    %c0_i32 = arith.constant 0 : i32
    %c0_i32_0 = arith.constant 0 : i32
    return %arg0, %c0_i32, %arg1 : i32, i32, i32
  }
  func.func @transform_4(%arg0: i32, %arg1: i32) -> (i32, i32, i32) {
    %c0_i32 = arith.constant 0 : i32
    %c0_i32_0 = arith.constant 0 : i32
    return %arg0, %c0_i32, %arg1 : i32, i32, i32
  }
}

</mosaic_0001>

<bundles_post_ra>
// kernel: tpu_custom_call.1
= control target key start
LH: loop header
LB: loop body
LE: loop exit
PB: predicated region body
PF: predicated region fallthrough
CT: control target
= control target key end

     0   :  { %9 = vsyncpa [#allocation3], 0  ;;  %s1320_s0 = inlined_call_operand.hbm [shape: f32[16,32], index: 0, kind: input, shape index: {}]   ;;  %s1321_s1 = inlined_call_operand.vmem [shape: f32[16,1], index: 1, kind: input, shape index: {}]   ;;  %s1322_s2 = inlined_call_operand.vmem [shape: f32[2,32,256], index: 2, kind: input, shape index: {}]   ;;  %s1323_s3 = inlined_call_operand.vmem [shape: f32[2,11,256], index: 3, kind: input, shape index: {}]   ;;  %s1324_s4 = inlined_call_operand.hbm [shape: f32[2,160,256], index: 4, kind: output, shape index: {}]  }
   0x1   :  { %10 = vsyncpa [#allocation4], 0 }
   0x2   :  { %12 = vsyncpa [#allocation4 + $0x1], 0  ;;  %s1028_s15 = smov 0   ;;  %s1030_s16 = smov 0  }
   0x3   :  { %s1032_s17 = smov 0   ;;  %s1034_s18 = smov 0  }
   0x4   :  { %s1036_s19 = smov 0   ;;  %s1038_s20 = smov 0  }
   0x5   :  { %s1040_s21 = smov 0   ;;  %s1042_s22 = smov 0  }
   0x6 LB: > { %s725_s23 = sadd.s32 4294967295, %s993_s22   ;;  %s726_s24 = sadd.s32 4294967294, %s993_s22   ;;  %s993_s22 = sphi %s1042_s22, %s18_s22   ;;  %s989_s21 = sphi %s1040_s21, %s1355_s21   ;;  %s985_s20 = sphi %s1038_s20, %s1354_s20   ;;  %s981_s19 = sphi %s1036_s19, %s1353_s19   ;;  %s977_s18 = sphi %s1034_s18, %s1352_s18   ;;  %s973_s17 = sphi %s1032_s17, %s1351_s17   ;;  %s969_s16 = sphi %s1030_s16, %s1350_s16   ;;  %s965_s15 = sphi %s1028_s15, %s1349_s15  }
   0x7   : > { %s27_s25 = sadd.s32 1, %s985_s20  ;;  %s30_s26 = sadd.s32 1, %s989_s21 }
   0x8   : > { %p28_p0 = scmp.ge.s32.totalorder %s27_s25, 2  ;;  %s81_s27 = sadd.s32 1, %s973_s17 }
   0x9   : > { %p88_p1 = scmp.ne.s32.totalorder %s973_s17, %s969_s16  ;;  %p89_p2 = scmp.eq.s32.totalorder %s993_s22, 0 }
   0xa   : > { %s1357_s25 = smov (%p28_p0, %s27_s25), 0  ;;  %s1359_s26 = smov (!%p28_p0, %s30_s26), %s989_s21 }
   0xb   : > { %1331 = sst [smem:[#allocation10_spill]] %s1357_s25  ;;  %s77_s28 = ssub.s32 %s985_s20, %s1357_s25 }
   0xc   : > { %p1081_p3 = por %p89_p2, %p88_p1  ;;  %p32_p4 = scmp.ge.s32.totalorder %s1359_s26, 2 }
   0xd   : > { %p148_p5 = scmp.eq.s32.totalorder %s725_s23, 3  ;;  %p153_p6 = scmp.ne.s32.totalorder %s969_s16, %s965_s15 }
   0xe   : > { %s1332_s29 = scalar_select %p1081_p3, 1, 0 }
   0xf   : > { %p154_p7 = scmp.eq.s32.totalorder %s726_s24, 3  ;;  %s1361_s26 = smov (%p32_p4, %s1359_s26), 0 }
  0x10   : > { %1333 = sst [smem:[#allocation11_spill]] %s1361_s26  ;;  %p1089_p8 = por %p148_p5, %p88_p1 }
  0x11   : > { %p1093_p9 = por %p154_p7, %p153_p6  ;;  %s76_s6 = ssub.s32 %s989_s21, %s1361_s26 }
  0x12   : > { %s1334_s30 = scalar_select %p1089_p8, 1, 0 }
  0x13   : > { %s1335_s5 = scalar_select %p1093_p9, 1, 0 }
  0x14   : > { %p727_p10 = scmp.ge.s32.totalorder %s993_s22, 1  ;;  %s78_s7 = sor.u32 %s77_s28, %s76_s6 }
  0x15   : > { %p161_p11 = scmp.lt.s32.totalorder %s993_s22, 5  ;;  %p79_p12 = scmp.eq.s32.totalorder %s78_s7, 0 }
  0x16   : > { %p1105_p0 = scmp.eq.s32.totalorder %s725_s23, 0  ;;  %s995_s11 = smov [#allocation2]  }
  0x17   : > { %p1101_p13 = pnand %p727_p10, %p161_p11  ;;  %s173_s12 = sshll.u32 %s995_s11, 4  ;;  %s174_s12 = int_to_ptr.vmem [resolvable:$true] %s173_s12 }
  0x18   : > { %s1337_s9 = scalar_select %p1105_p0, 1, 0 }
  0x19   : > { %s1336_s8 = scalar_select %p1101_p13, 1, 0 }
  0x1a   : > { %s1110_s10 = scalar_select %p79_p12, %s973_s17, %s81_s27  }
  0x1b   : > { %p778_p1 = pneg %p1101_p13  ;;  %s867_s23 = scalar_lea.hbm %s1320_s0, 256 }
  0x1c   : > { %1338 = sst [smem:[#allocation12_spill]] %s1110_s10  ;;  %p868_p4 = scmp.ne.s32.totalorder %s1320_s0, %s867_s23 }
  0x1d   : > { %p1116_p2 = pnand %p1105_p0, %p778_p1  ;;  %p874_p10 = scmp.lt.u32.totalorder %s867_s23, %s1320_s0 }
  0x1f   : > { %p869_p5 = pneg %p1116_p2 }
  0x21   : > { %p870_p6 = pnand %p869_p5, %p868_p4 }
  0x23   : > { %p871_p7 = pneg %p870_p6 }
  0x25   : > { %p876_p11 = pnand %p874_p10, %p871_p7 }
  0x27   : > { %879 = shalt.err (!%p876_p11)
}
  0x28   : > { %s880_s11 = scalar_lea.vmem %s174_s12, 256  ;;  %p888_p8 = scmp.lt.s32.totalorder %s174_s12, %s174_s12 }
  0x29   : > { %p881_p12 = scmp.ne.s32.totalorder %s174_s12, %s880_s11  ;;  %p889_p0 = scmp.lt.s32.totalorder %s880_s11, %s880_s11 }
  0x2b   : > { %p883_p1 = pnand %p881_p12, %p869_p5  ;;  %p890_p13 = por %p889_p0, %p888_p8 }
  0x2d   : > { %p884_p9 = pneg %p883_p1 }
  0x2f   : > { %p891_p3 = pnand %p890_p13, %p884_p9 }
  0x31   : > { %894 = shalt.err (!%p891_p3)
}
  0x32   : > { %s996_s14 = smov 128   ;;  %s997_s24 = smov 8  }
  0x33   : > { %781 = dma.hbm_to_vmem [thread:$0]  (!%p1116_p2), %s1320_s0, 256, %s174_s12, [#allocation3], %s996_s14, %s996_s14, %s997_s24  }
  0x34   : > { %p729_p4 = scmp.ge.s32.totalorder %s993_s22, 4 }
  0x35   : > { %p1340_p6 = scmp.ne.s32.totalorder (!%p729_p4), %s1332_s29, 0 }
  0x36   : > { %186 = sbr.rel (%p729_p4) target bundleno = 78 (0x4e), region = 24 }
  0x3d   : > { %189 = sbr.rel (!%p1340_p6) target bundleno = 69 (0x45), region = 28  ;;  %s191_s23 = sand.u32 (%p1340_p6), 1, %s973_s17  }
  0x3e   : > { %s731_s27 = sshll.u32 (%p1340_p6), %s989_s21, 3  ;;  %s730_s7 = sshll.u32 (%p1340_p6), %s191_s23, 5 }
  0x3f   : > { %s195_s11 = sadd.s32 (%p1340_p6), %s985_s20, %s731_s27  ;;  %s193_s12 = scalar_lea.vmem (%p1340_p6), [#allocation5], %s730_s7 }
  0x40   : > { %s732_s26 = sshll.u32 (%p1340_p6), %s195_s11, 3 }
  0x41   : > { %s197_s10 = scalar_lea.vmem (%p1340_p6), %s1322_s2, %s732_s26 }
  0x42   : > { %v231_v0 = vld [vmem:[%s197_s10] sm:$0xff] (%p1340_p6)  ;;  %v233_v1 = vld [vmem:[%s197_s10 + $0x10] sm:$0xff] (%p1340_p6) }
  0x43   : > { %v235_v2 = vld [vmem:[%s197_s10 + $0x20] sm:$0xff] (%p1340_p6)  ;;  %232 = vst [vmem:[%s193_s12] sm:$0xff] (%p1340_p6), %v231_v0  ;;  %234 = vst [vmem:[%s193_s12 + $0x8] sm:$0xff] (%p1340_p6), %v233_v1  ;;  %v237_v3 = vld [vmem:[%s197_s10 + $0x30] sm:$0xff] (%p1340_p6) }
  0x44   : > { %236 = vst [vmem:[%s193_s12 + $0x10] sm:$0xff] %v235_v2  ;;  %238 = vst [vmem:[%s193_s12 + $0x18] sm:$0xff] %v237_v3 }
  0x45 PF: > { %p1341_p3 = scmp.ne.s32.totalorder %s1332_s29, 0 }
  0x46   : > { %s246_s14 = sand.u32 (%p1341_p3), 1, %s973_s17   ;;  %s734_s24 = sshll.u32 (%p1341_p3), %s989_s21, 2 }
  0x47   : > { %244 = sbr.rel (!%p1341_p3) target bundleno = 78 (0x4e), region = 66  ;;  %s733_s25 = sshll.u32 (%p1341_p3), %s246_s14, 4 }
  0x48   : > { %s250_s26 = sadd.s32 (%p1341_p3), %s985_s20, %s734_s24  ;;  %s248_s10 = scalar_lea.vmem (%p1341_p3), [#allocation6], %s733_s25 }
  0x49   : > { %s735_s28 = sshll.u32 (%p1341_p3), %s250_s26, 3 }
  0x4a   : > { %s252_s27 = scalar_lea.vmem (%p1341_p3), %s1323_s3, %s735_s28 }
  0x4b   : > { %v282_v4 = vld [vmem:[%s252_s27] sm:$0xff] (%p1341_p3)  ;;  %v284_v5 = vld [vmem:[%s252_s27 + $0x10] sm:$0xff] (%p1341_p3) }
  0x4c   : > { %283 = vst [vmem:[%s248_s10] sm:$0xff] (%p1341_p3), %v282_v4  ;;  %285 = vst [vmem:[%s248_s10 + $0x8] sm:$0xff] (%p1341_p3), %v284_v5 }
  0x4e PF: > { %p1342_p8 = scmp.ne.s32.totalorder %s1336_s8, 0 }
  0x4f   : > { %p1343_p9 = scmp.ne.s32.totalorder (!%p1342_p8), %s1337_s9, 0 }
  0x50   : > { %294 = sbr.rel (%p1342_p8) target bundleno = 353 (0x161), region = 104 }
  0x57   : > { %956 = dma.done.wait (%p1343_p9), [#allocation3], 256  }
  0x58   : > { %958 = vsyncadd (%p1343_p9), [#allocation3], 4294967040  ;;  %s1160_s29 = sand.u32 1, %s969_s16   ;;  %v998_v6 = vmov 0   ;;  %vm355_vm0 = vcmask 261120   ;;  %v337_v13 = vld [vmem:[#allocation2] sm:$0xff]  ;;  %v467_v41 = vlaneseq }
  0x59   : > { %s738_s7 = sshll.u32 %s1160_s29, 5  ;;  %860 = vset.pattern.permute.xlu0 %v998_v6  ;;  %v343_v14 = vld [vmem:[%s1321_s1] sm:$0xff]  ;;  %759 = vmatprep.mubr.msk.f32.mxu0 %vm355_vm0, %v337_v13  ;;  %v344_v15 = vld [vmem:[%s1321_s1 + $0x8] sm:$0xff]  ;;  %s739_s14 = sshll.u32 %s1160_s29, 4  ;;  %vm441_vm1 = vcmask 1042432  }
  0x5a   : > { %s303_s11 = scalar_lea.vmem [#allocation5], %s738_s7  ;;  %347 = vperm.xlu0 %860, %v343_v14   ;;  %v338_v16 = vld [vmem:[#allocation2 + $0x8] sm:$0xff]  ;;  %s310_s24 = scalar_lea.vmem [#allocation6], %s739_s14  ;;  %v1174_v43 = vshrl.u32 %v467_v41, 7 }
  0x5b   : > { %v339_v7 = vld [vmem:[%s303_s11] sm:$0xff]  ;;  %v340_v8 = vld [vmem:[%s303_s11 + $0x8] sm:$0xff]  ;;  %v341_v10 = vld [vmem:[%s303_s11 + $0x10] sm:$0xff]  ;;  %s770_s25 = smul.u32 160, %s1160_s29  ;;  %s596_s7 = scalar_lea.sflag [#allocation4], %s1160_s29 }
  0x5c   : > { %v762_v9 = vpack.c.bf16 %v340_v8, %v339_v7  ;;  %v342_v11 = vld [vmem:[%s303_s11 + $0x18] sm:$0xff]  ;;  %v439_v18 = vld [vmem:[%s310_s24] sm:$0xff]  ;;  %v469_v47 = vsub.s32 0, %v1174_v43  ;;  %v477_v48 = vsub.s32 1, %v1174_v43  ;;  %v485_v50 = vsub.s32 2, %v1174_v43  ;;  %s771_s26 = smul.u32 40, %s981_s19 }
  0x5d   : > { %v766_v12 = vpack.c.bf16 %v342_v11, %v341_v10  ;;  %v440_v17 = vld [vmem:[%s310_s24 + $0x8] sm:$0x7]  ;;  %v493_v51 = vsub.s32 3, %v1174_v43  ;;  %v501_v52 = vsub.s32 4, %v1174_v43  ;;  %v509_v54 = vsub.s32 5, %v1174_v43  ;;  %s1201_s28 = scalar_lea.vmem [#allocation7], %s770_s25 }
  0x5e   : > { %763 = vmatprep.subr.bf16.mxu0 %v762_v9  ;;  %352 = vperm.xlu0 %860, %v344_v15   ;;  %v442_v19 = vsel %vm441_vm1, %v440_v17, -inf  ;;  %v517_v55 = vsub.s32 6, %v1174_v43  ;;  %v525_v56 = vsub.s32 7, %v1174_v43  ;;  %s1199_s19 = sadd.s32 %s977_s18, %s771_s26  ;;  %s610_s6 = sshll.u32 %s1201_s28, 4  ;;  %s1250_s6 = int_to_ptr.vmem [resolvable:$true] %s610_s6 }
  0x5f   : > { %765 = vmatpush3.bf16.msra.mxu0 %v762_v9  ;;  %v443_v20 = vmax.f32 %v439_v18, %v442_v19  ;;  %s742_s18 = sshll.u32 %s1199_s19, 7  ;;  %s895_s11 = scalar_lea.vmem %s1250_s6, 2560 }
  0x60   : > { %767 = vmatprep.subr.bf16.mxu0 %v766_v12  ;;  %s1240_s10 = scalar_lea.hbm %s1324_s4, %s742_s18  ;;  %p896_p13 = scmp.ne.s32.totalorder %s1250_s6, %s895_s11 }
  0x61   : > { %v444_v21 = vrot.slane %v443_v20, 4  ;;  %p1344_p0 = scmp.ne.s32.totalorder %s1334_s30, 0  ;;  %s999_s8 = smov [#allocation7]  }
  0x62   : > { %s899_s9 = sshll.u32 %s999_s8, 4  ;;  %s900_s9 = int_to_ptr.vmem [resolvable:$false] %s899_s9 }
  0x63   : > { %769 = vmatpush3.bf16.msra.mxu0 %v766_v12  ;;  %v445_v22 = vmax.f32 %v443_v20, %v444_v21  ;;  %p897_p2 = pnand %p896_p13, %p1344_p0  ;;  %s901_s13 = scalar_lea.vmem %s900_s9, 5120 }
  0x64   : > { %p902_p7 = scmp.lt.s32.totalorder %s1250_s6, %s900_s9  ;;  %p903_p10 = scmp.lt.s32.totalorder %s901_s13, %s895_s11 }
  0x65   : > { %v446_v23 = vrot.slane %v445_v22, 2  ;;  %p898_p5 = pneg %p897_p2 }
  0x66   : > { %760 = vmatmul.mubr.msk.f32.vlgmr.msra.gmra.mrb[0].mxu0 %vm355_vm0, %v338_v16  ;;  %p904_p11 = por %p903_p10, %p902_p7 }
  0x67   : > { %v447_v24 = vmax.f32 %v445_v22, %v446_v23 }
  0x68   : > { %p905_p12 = pnand %p904_p11, %p898_p5 }
  0x69   : > { %v448_v25 = vrot.slane %v447_v24, 1 }
  0x6b   : > { %v449_v26 = vmax.f32 %v447_v24, %v448_v25 }
  0x6d   : > { %v451_v27 = vsub.f32 %v440_v17, %v449_v26  ;;  %v450_v28 = vsub.f32 %v439_v18, %v449_v26 }
  0x6f   : > { %v454_v29 = vmul.f32 1.442695, %v451_v27  ;;  %v452_v30 = vmul.f32 1.442695, %v450_v28 }
  0x71   : > { %861 = vpow2.f32 %v454_v29 }
  0x72   : > { %863 = vpow2.f32 %v452_v30 }
  0x7b   : > { %v862_v31 = vpop.eup %861 }
  0x7c   : > { %v864_v32 = vpop.eup %863  ;;  %v456_v33 = vsel %vm441_vm1, %v862_v31, 0.0 }
  0x7d   : > { %v457_v34 = vadd.f32 %v864_v32, %v456_v33 }
  0x7f   : > { %v458_v35 = vrot.slane %v457_v34, 4 }
  0x81   : > { %v459_v36 = vadd.f32 %v458_v35, %v457_v34 }
  0x83   : > { %v460_v37 = vrot.slane %v459_v36, 2 }
  0x85   : > { %v461_v38 = vadd.f32 %v460_v37, %v459_v36 }
  0x87   : > { %v462_v39 = vrot.slane %v461_v38, 1 }
  0x89   : > { %v463_v40 = vadd.f32 %v462_v39, %v461_v38 }
  0x8b   : > { %865 = vrcp.f32 %v463_v40 }
  0x95   : > { %v866_v44 = vpop.eup %865 }
  0x96   : > { %v1185_v58 = vmul.f32 %v866_v44, %v864_v32  ;;  %v1187_v59 = vmul.f32 %v866_v44, %v862_v31 }
  0xd9   : > { %v348_v42 = vpop.permute.xlu0 %347 }
  0xdd   : > { %v353_v45 = vpop.permute.xlu0 %352 }
 0x139   : > { %v761_v46 = vpop.f32.mrb[0].mxu0 }
 0x13a   : > { %v434_v49 = vadd.f32 %v761_v46, %v353_v45  ;;  %v428_v53 = vpop.f32.mrb[1].mxu0 }
 0x13b   : > { %v429_v57 = vadd.f32 %v428_v53, %v348_v42 }
 0x13c   : > { %v438_v60 = vmax.f32 %v434_v49, 0.0 }
 0x13d   : > { %v437_v61 = vmax.f32 %v429_v57, 0.0 }
 0x13e   : > { %v534_v62 = vrot.slane %v438_v60, %v469_v47  ;;  %v542_v63 = vrot.slane %v438_v60, %v477_v48  ;;  %v550_v0 = vrot.slane %v438_v60, %v485_v50  ;;  %v558_v1 = vrot.slane %v438_v60, %v493_v51 }
 0x13f   : > { %v566_v2 = vrot.slane %v438_v60, %v501_v52  ;;  %v574_v3 = vrot.slane %v438_v60, %v509_v54  ;;  %v582_v4 = vrot.slane %v438_v60, %v517_v55  ;;  %v590_v5 = vrot.slane %v438_v60, %v525_v56 }
 0x140   : > { %v535_v6 = vmul.f32 %v534_v62, %v1185_v58  ;;  %v536_v7 = vmul.f32 %v534_v62, %v1187_v59  ;;  %v543_v8 = vmul.f32 %v542_v63, %v1185_v58  ;;  %v544_v9 = vmul.f32 %v542_v63, %v1187_v59 }
 0x141   : > { %v551_v10 = vmul.f32 %v550_v0, %v1185_v58  ;;  %v552_v11 = vmul.f32 %v550_v0, %v1187_v59  ;;  %v559_v12 = vmul.f32 %v558_v1, %v1185_v58  ;;  %v560_v13 = vmul.f32 %v558_v1, %v1187_v59 }
 0x142   : > { %537 = vst [vmem:[%s1201_s28 + $0x50] sm:$0xff] %v535_v6  ;;  %538 = vst [vmem:[%s1201_s28 + $0x58] sm:$0x3] %v536_v7  ;;  %v567_v14 = vmul.f32 %v566_v2, %v1185_v58  ;;  %v568_v15 = vmul.f32 %v566_v2, %v1187_v59  ;;  %v575_v16 = vmul.f32 %v574_v3, %v1185_v58 }
 0x143   : > { %545 = vst [vmem:[%s1201_s28 + $0x5a] sm:$0xff] %v543_v8  ;;  %546 = vst [vmem:[%s1201_s28 + $0x62] sm:$0x3] %v544_v9  ;;  %v576_v17 = vmul.f32 %v574_v3, %v1187_v59  ;;  %v583_v18 = vmul.f32 %v582_v4, %v1185_v58  ;;  %v584_v19 = vmul.f32 %v582_v4, %v1187_v59 }
 0x144   : > { %553 = vst [vmem:[%s1201_s28 + $0x64] sm:$0xff] %v551_v10  ;;  %554 = vst [vmem:[%s1201_s28 + $0x6c] sm:$0x3] %v552_v11  ;;  %v591_v20 = vmul.f32 %v590_v5, %v1185_v58  ;;  %v592_v21 = vmul.f32 %v590_v5, %v1187_v59  ;;  %v470_v22 = vrot.slane %v437_v61, %v469_v47 }
 0x145   : > { %561 = vst [vmem:[%s1201_s28 + $0x6e] sm:$0xff] %v559_v12  ;;  %562 = vst [vmem:[%s1201_s28 + $0x76] sm:$0x3] %v560_v13  ;;  %v478_v23 = vrot.slane %v437_v61, %v477_v48  ;;  %v486_v24 = vrot.slane %v437_v61, %v485_v50  ;;  %v494_v25 = vrot.slane %v437_v61, %v493_v51 }
 0x146   : > { %569 = vst [vmem:[%s1201_s28 + $0x78] sm:$0xff] %v567_v14  ;;  %570 = vst [vmem:[%s1201_s28 + $0x80] sm:$0x3] %v568_v15  ;;  %v502_v26 = vrot.slane %v437_v61, %v501_v52  ;;  %v510_v27 = vrot.slane %v437_v61, %v509_v54  ;;  %v518_v28 = vrot.slane %v437_v61, %v517_v55 }
 0x147   : > { %577 = vst [vmem:[%s1201_s28 + $0x82] sm:$0xff] %v575_v16  ;;  %578 = vst [vmem:[%s1201_s28 + $0x8a] sm:$0x3] %v576_v17  ;;  %v526_v29 = vrot.slane %v437_v61, %v525_v56  ;;  %v471_v30 = vmul.f32 %v470_v22, %v1185_v58  ;;  %v472_v31 = vmul.f32 %v470_v22, %v1187_v59 }
 0x148   : > { %585 = vst [vmem:[%s1201_s28 + $0x8c] sm:$0xff] %v583_v18  ;;  %586 = vst [vmem:[%s1201_s28 + $0x94] sm:$0x3] %v584_v19  ;;  %v479_v32 = vmul.f32 %v478_v23, %v1185_v58  ;;  %v480_v33 = vmul.f32 %v478_v23, %v1187_v59  ;;  %v487_v34 = vmul.f32 %v486_v24, %v1185_v58 }
 0x149   : > { %593 = vst [vmem:[%s1201_s28 + $0x96] sm:$0xff] %v591_v20  ;;  %594 = vst [vmem:[%s1201_s28 + $0x9e] sm:$0x3] %v592_v21  ;;  %v488_v35 = vmul.f32 %v486_v24, %v1187_v59  ;;  %v495_v36 = vmul.f32 %v494_v25, %v1185_v58  ;;  %v496_v37 = vmul.f32 %v494_v25, %v1187_v59 }
 0x14a   : > { %473 = vst [vmem:[%s1201_s28] sm:$0xff] %v471_v30  ;;  %474 = vst [vmem:[%s1201_s28 + $0x8] sm:$0x3] %v472_v31  ;;  %v503_v38 = vmul.f32 %v502_v26, %v1185_v58  ;;  %v504_v39 = vmul.f32 %v502_v26, %v1187_v59  ;;  %v511_v40 = vmul.f32 %v510_v27, %v1185_v58 }
 0x14b   : > { %481 = vst [vmem:[%s1201_s28 + $0xa] sm:$0xff] %v479_v32  ;;  %482 = vst [vmem:[%s1201_s28 + $0x12] sm:$0x3] %v480_v33  ;;  %v512_v41 = vmul.f32 %v510_v27, %v1187_v59  ;;  %v519_v42 = vmul.f32 %v518_v28, %v1185_v58  ;;  %v520_v43 = vmul.f32 %v518_v28, %v1187_v59 }
 0x14c   : > { %489 = vst [vmem:[%s1201_s28 + $0x14] sm:$0xff] %v487_v34  ;;  %490 = vst [vmem:[%s1201_s28 + $0x1c] sm:$0x3] %v488_v35  ;;  %v527_v44 = vmul.f32 %v526_v29, %v1185_v58  ;;  %v528_v45 = vmul.f32 %v526_v29, %v1187_v59 }
 0x14d   : > { %497 = vst [vmem:[%s1201_s28 + $0x1e] sm:$0xff] %v495_v36  ;;  %498 = vst [vmem:[%s1201_s28 + $0x26] sm:$0x3] %v496_v37 }
 0x14e   : > { %505 = vst [vmem:[%s1201_s28 + $0x28] sm:$0xff] %v503_v38  ;;  %506 = vst [vmem:[%s1201_s28 + $0x30] sm:$0x3] %v504_v39 }
 0x14f   : > { %513 = vst [vmem:[%s1201_s28 + $0x32] sm:$0xff] %v511_v40  ;;  %514 = vst [vmem:[%s1201_s28 + $0x3a] sm:$0x3] %v512_v41 }
 0x150   : > { %521 = vst [vmem:[%s1201_s28 + $0x3c] sm:$0xff] %v519_v42  ;;  %522 = vst [vmem:[%s1201_s28 + $0x44] sm:$0x3] %v520_v43 }
 0x151   : > { %529 = vst [vmem:[%s1201_s28 + $0x46] sm:$0xff] %v527_v44  ;;  %530 = vst [vmem:[%s1201_s28 + $0x4e] sm:$0x3] %v528_v45 }
 0x152   : > { %908 = shalt.err (!%p905_p12)
}
 0x153   : > { %s909_s12 = scalar_lea.hbm %s1240_s10, 2560  ;;  %s913_s25 = scalar_lea.hbm %s1324_s4, 10240 }
 0x154   : > { %p910_p1 = scmp.ne.s32.totalorder %s1240_s10, %s909_s12  ;;  %p914_p3 = scmp.lt.u32.totalorder %s1240_s10, %s1324_s4 }
 0x155   : > { %p915_p8 = scmp.lt.u32.totalorder %s913_s25, %s909_s12  ;;  %p917_p13 = scmp.lt.u32.totalorder %s909_s12, %s1240_s10 }
 0x156   : > { %p911_p4 = pnand %p910_p1, %p1344_p0 }
 0x157   : > { %p916_p9 = por %p915_p8, %p914_p3 }
 0x158   : > { %p912_p6 = pneg %p911_p4 }
 0x159   : > { %p918_p2 = por %p917_p13, %p916_p9 }
 0x15b   : > { %p919_p5 = pnand %p918_p2, %p912_p6 }
 0x15d   : > { %922 = shalt.err (!%p919_p5)
}
 0x15e   : > { %s1000_s28 = smov 128   ;;  %s1001_s18 = smov 256  }
 0x15f   : > { %s1002_s23 = smov 8  }
 0x160   : > { %776 = dma.vmem_to_hbm [thread:$0]  (%p1344_p0), %s1250_s6, 2560, %s1240_s10, %s596_s7, %s1000_s28, %s1001_s18, %s1002_s23  }
 0x161 PF: > { %p788_p7 = scmp.ge.s32.totalorder %s993_s22, 2  ;;  %s625_s27 = sand.u32 1, %s965_s15  }
 0x162   : > { %p1345_p10 = scmp.ne.s32.totalorder %s1335_s5, 0  ;;  %s626_s11 = scalar_lea.sflag [#allocation4], %s625_s27 }
 0x164   : > { %p783_p11 = pnand %p788_p7, %p1345_p10 }
 0x166   : > { %960 = dma.done.wait (!%p783_p11), %s626_s11, 2560  }
 0x167   : > { %962 = vsyncadd (!%p783_p11), %s626_s11, 4294964736  ;;  %s18_s22 = sadd.s32 1, %s993_s22   ;;  %s1346_s8 = sld [smem:[#allocation12_spill]] }
 0x168   : > { %p15_p12 = scmp.ge.s32.totalorder %s18_s22, 6   ;;  %s1347_s30 = sld [smem:[#allocation10_spill]] }
 0x169   : > { %s1348_s29 = sld [smem:[#allocation11_spill]]  ;;  %s1349_s15 = smov %s969_s16 }
 0x16a   : > { %s1350_s16 = smov %s973_s17  ;;  %s1352_s18 = smov %s985_s20 }
 0x16b   : > { %s1353_s19 = smov %s989_s21  ;;  %17 = sbr.rel (!%p15_p12) target bundleno = 6 (0x6), region = 165 }
 0x16d   : > { %s1351_s17 = smov %s1346_s8 }
 0x16e   : > { %s1354_s20 = smov %s1347_s30 }
 0x16f   : > { %s1355_s21 = smov %s1348_s29 }
 0x172   :  { %631 = vsyncpa [#allocation3], 1 }
 0x173   :  { %633 = vsyncpa [#allocation3 + $0x1], 1 }
 0x174   :  { %634 = vsyncpa [#allocation4], 1 }
 0x175   :  { %636 = vsyncpa [#allocation4 + $0x1], 1 }

</bundles_post_ra>
